<compile_context>
chip_gen: v6e
topology: v6e:2x2x1
jax: 0.10.0
libtpu: 0.0.40
codegen_flags: <defaults>
</compile_context>

<pallas_src>
import jax
import jax.numpy as jnp
from jax.experimental import pallas as pl
from jax.experimental.pallas import tpu as pltpu


_LANES = 1024      # lane-dense last dim (multiple of 128 -> unmasked vst)
_SUBLANES = 8      # f32 sublane granularity; scaled by packing for narrow dtypes


def _gmof_kernel(rho_sq_ref, x_ref, o_ref):
    x = x_ref[...]
    rho_sq = rho_sq_ref[0].astype(x.dtype)     # one SMEM scalar load
    sq = x * x
    # Same operation order as the reference: rho^2 * (sq / (sq + rho^2)).
    o_ref[...] = rho_sq * (sq / (sq + rho_sq))


def _tpu_tuning():
    """(max tile rows, vmem_limit_bytes or None) per TPU generation."""
    try:
        kind = jax.devices()[0].device_kind.lower()
    except Exception:  # pragma: no cover - CPU interpret / unknown backend
        kind = ""
    if "v7" in kind:
        # 4 MiB blocks; 16 MiB live double-buffered + scratch, raise scoped VMEM.
        return 1024, 40 * 1024 * 1024
    if "v6" in kind:
        # 4 MiB blocks fit the 32 MiB default; set explicitly for headroom.
        return 1024, 32 * 1024 * 1024
    # v5e and older: 2 MiB blocks keep us inside the 16 MiB default budget.
    return 512, None


def gmof(residual: jax.Array, rho=1.0) -> jax.Array:
    """Pallas TPU implementation of GMoF.forward (elementwise)."""
    orig_shape = residual.shape
    dtype = residual.dtype
    n = residual.size

    if n == 0:  # degenerate input: nothing to do
        return residual

    # rho^2 as a runtime scalar (no recompile per rho; supports traced rho).
    rho_sq = (jnp.asarray(rho, jnp.float32) ** 2).reshape(1)

    # ---- lane-dense 2-D view --------------------------------------------
    rows = -(-n // _LANES)
    padded_n = rows * _LANES
    flat = residual.reshape(-1)
    if padded_n != n:
        # Only the sub-1024 remainder forces a pad (see TODO at top of file).
        flat = jnp.pad(flat, (0, padded_n - n))
    x2d = flat.reshape(rows, _LANES)

    # ---- tiling -----------------------------------------------------------
    itemsize = jnp.dtype(dtype).itemsize
    sub = _SUBLANES * max(1, 4 // max(1, itemsize))   # 8 f32 / 16 bf16 / 32 int8
    tile_rows_max, vmem_limit = _tpu_tuning()

    if rows < 2 * sub:
        # Tiny input: one full-array block (block_shape == array dims is legal
        # for any row count).
        tile_rows = rows
        grid_len = 1
    else:
        # Aim for >= ~4 grid steps (pipeline overlap + both v7x TensorCores),
        # capped at the per-generation block size; the ragged last block is
        # masked by Pallas.
        target = -(-rows // 4)
        target = ((target + sub - 1) // sub) * sub
        tile_rows = min(tile_rows_max, target)
        grid_len = -(-rows // tile_rows)

    compiler_kwargs = dict(dimension_semantics=("parallel",))
    if vmem_limit is not None:
        compiler_kwargs["vmem_limit_bytes"] = vmem_limit

    out2d = pl.pallas_call(
        _gmof_kernel,
        out_shape=jax.ShapeDtypeStruct((rows, _LANES), dtype),
        grid_spec=pltpu.PrefetchScalarGridSpec(
            num_scalar_prefetch=0,
            grid=(grid_len,),
            in_specs=[
                pl.BlockSpec(memory_space=pltpu.MemorySpace.SMEM),   # rho^2
                pl.BlockSpec((tile_rows, _LANES), lambda i: (i, 0)),  # residual
            ],
            out_specs=pl.BlockSpec((tile_rows, _LANES), lambda i: (i, 0)),
        ),
        compiler_params=pltpu.CompilerParams(**compiler_kwargs),
    )(rho_sq, x2d)

    out_flat = out2d.reshape(-1)
    if padded_n != n:
        out_flat = out_flat[:n]
    return out_flat.reshape(orig_shape)


def gmof_ref(residual: jax.Array, rho=1.0) -> jax.Array:
    sq = residual ** 2
    return (rho ** 2) * (sq / (sq + rho ** 2))


if __name__ == "__main__":
    key = jax.random.PRNGKey(0)
    k1, k2, k3 = jax.random.split(key, 3)

    # Lane-aligned case: 2*4*16*16 = 2048 = 2*1024 -> no pad, single full block.
    x1 = jax.random.normal(k1, (2, 4, 16, 16), dtype=jnp.float32)
    # Unaligned + multi-block ragged case: 2*3*2900 = 17400 -> 17 rows, 3 steps,
    # masked boundary block.
    x2 = jax.random.normal(k2, (2, 3, 2900), dtype=jnp.float32) * 3.0
    # Tiny unaligned case.
    x3 = jax.random.normal(k3, (3, 7, 11), dtype=jnp.float32)

    for x, rho in ((x1, 1.0), (x2, 0.5), (x3, 2.0)):
        out = jax.block_until_ready(gmof(x, rho=rho))
        ref = gmof_ref(x, rho=rho)
        assert out.shape == x.shape and out.dtype == x.dtype
        assert jnp.allclose(out, ref, atol=1e-6, rtol=1e-6), (x.shape, rho)

    print("KERNEL_OK")
</pallas_src>

<mosaic_0001>
module attributes {stable_mosaic.version = 11 : i64} {
  func.func @_gmof_kernel(%arg0: i32, %arg1: memref<1xf32, #tpu.memory_space<smem>>, %arg2: memref<2x1024xf32, #tpu.memory_space<vmem>>, %arg3: memref<2x1024xf32, #tpu.memory_space<vmem>>) attributes {dimension_semantics = [#tpu.dimension_semantics<parallel>], iteration_bounds = array<i64: 1>, scalar_prefetch = 0 : i64, scratch_operands = 0 : i64, tpu.core_type = #tpu.core_type<tc>, window_params = [{transform_indices = @transform_0, window_bounds = array<i64: 1>}, {transform_indices = @transform_1, window_bounds = array<i64: 2, 1024>}, {transform_indices = @transform_2, window_bounds = array<i64: 2, 1024>}]} {
    %c0 = arith.constant 0 : index
    %c0_0 = arith.constant 0 : index
    %0 = vector.load %arg2[%c0, %c0_0] : memref<2x1024xf32, #tpu.memory_space<vmem>>, vector<2x1024xf32>
    %c0_1 = arith.constant 0 : index
    %1 = memref.load %arg1[%c0_1] : memref<1xf32, #tpu.memory_space<smem>>
    %2 = arith.mulf %0, %0 : vector<2x1024xf32>
    %3 = vector.broadcast %1 : f32 to vector<2x1024xf32>
    %4 = arith.addf %2, %3 : vector<2x1024xf32>
    %5 = arith.divf %2, %4 : vector<2x1024xf32>
    %6 = vector.broadcast %1 : f32 to vector<2x1024xf32>
    %7 = arith.mulf %6, %5 : vector<2x1024xf32>
    %c0_2 = arith.constant 0 : index
    %c0_3 = arith.constant 0 : index
    %8 = vector.load %arg3[%c0_2, %c0_3] : memref<2x1024xf32, #tpu.memory_space<vmem>>, vector<2x1024xf32>
    tpu.vector_store %arg3[%c0_2, %c0_3], %7 {strides = array<i32>} : memref<2x1024xf32, #tpu.memory_space<vmem>>, vector<2x1024xf32>,
    return
  }
  func.func @transform_0(%arg0: i32) -> i32 {
    %c0_i32 = arith.constant 0 : i32
    %c0_i32_0 = arith.constant 0 : i32
    return %c0_i32 : i32
  }
  func.func @transform_1(%arg0: i32) -> (i32, i32) {
    %c0_i32 = arith.constant 0 : i32
    %c0_i32_0 = arith.constant 0 : i32
    return %arg0, %c0_i32 : i32, i32
  }
  func.func @transform_2(%arg0: i32) -> (i32, i32) {
    %c0_i32 = arith.constant 0 : i32
    %c0_i32_0 = arith.constant 0 : i32
    return %arg0, %c0_i32 : i32, i32
  }
}

</mosaic_0001>

<bundles_post_ra>
// kernel: tpu_custom_call.1
= control target key start
LH: loop header
LB: loop body
LE: loop exit
PB: predicated region body
PF: predicated region fallthrough
CT: control target
= control target key end

     0   :  { %8 = vsyncpa [#allocation4], 0  ;;  %s132_s0 = inlined_call_operand.<no memory space> [shape: f32[1], index: 0, kind: input, shape index: {}]   ;;  %s133_s1 = inlined_call_operand.hbm [shape: f32[2,1024], index: 1, kind: input, shape index: {}]   ;;  %s134_s2 = inlined_call_operand.hbm [shape: f32[2,1024], index: 2, kind: output, shape index: {}]  }
   0x1   :  { %9 = vsyncpa [#allocation5], 0  ;;  %s106_s9 = smov [#allocation3]  }
   0x2   :  { %s18_s10 = sshll.u32 %s106_s9, 4  ;;  %s19_s10 = int_to_ptr.vmem [resolvable:$true] %s18_s10 }
   0x3   :  { %s70_s11 = scalar_lea.vmem %s19_s10, 256  ;;  %p75_p1 = scmp.lt.s32.totalorder %s19_s10, %s19_s10 }
   0x4   :  { %p71_p0 = scmp.ne.s32.totalorder %s19_s10, %s70_s11  ;;  %p76_p2 = scmp.lt.s32.totalorder %s70_s11, %s70_s11 }
   0x6   :  { %p77_p3 = por %p76_p2, %p75_p1 }
   0x8   :  { %p78_p4 = pnand %p77_p3, %p71_p0 }
   0xa   :  { %81 = shalt.err (!%p78_p4)
}
   0xb   :  { %21 = dma.hbm_to_vmem [thread:$0]  %s133_s1, 256, %s19_s10, [#allocation4]  }
   0xc   :  { %102 = dma.done.wait [#allocation4], 256  }
   0xd   :  { %103 = vsyncadd [#allocation4], 4294967040  ;;  %v25_v0 = vld [vmem:[#allocation3] sm:$0xff]  ;;  %v30_v1 = vstv %s132_s0  ;;  %v26_v2 = vld [vmem:[#allocation3 + $0x8] sm:$0xff]  ;;  %s107_s16 = smov [#allocation6]  }
   0xe   :  { %v28_v3 = vmul.f32 %v25_v0, %v25_v0  ;;  %v29_v4 = vmul.f32 %v26_v2, %v26_v2  ;;  %s47_s17 = sshll.u32 %s107_s16, 4  ;;  %s48_s17 = int_to_ptr.vmem [resolvable:$true] %s47_s17 }
   0xf   :  { %s82_s1 = scalar_lea.vmem %s48_s17, 256  ;;  %p87_p6 = scmp.lt.s32.totalorder %s48_s17, %s48_s17 }
  0x10   :  { %v31_v5 = vadd.f32 %v30_v1, %v28_v3  ;;  %v32_v6 = vadd.f32 %v30_v1, %v29_v4  ;;  %p83_p5 = scmp.ne.s32.totalorder %s48_s17, %s82_s1  ;;  %p88_p7 = scmp.lt.s32.totalorder %s82_s1, %s82_s1 }
  0x12   :  { %58 = vrcp.f32 %v31_v5  ;;  %p89_p8 = por %p88_p7, %p87_p6 }
  0x13   :  { %60 = vrcp.f32 %v32_v6 }
  0x14   :  { %p90_p9 = pnand %p89_p8, %p83_p5 }
  0x1f   :  { %v59_v7 = vpop.eup %58 }
  0x20   :  { %v61_v8 = vpop.eup %60  ;;  %v34_v9 = vmul.f32 %v59_v7, %v28_v3 }
  0x21   :  { %v36_v10 = vmul.f32 %v61_v8, %v29_v4 }
  0x22   :  { %v37_v11 = vmul.f32 %v34_v9, %v30_v1 }
  0x23   :  { %v38_v12 = vmul.f32 %v36_v10, %v30_v1 }
  0x24   :  { %39 = vst [vmem:[#allocation6] sm:$0xff] %v37_v11 }
  0x25   :  { %40 = vst [vmem:[#allocation6 + $0x8] sm:$0xff] %v38_v12 }
  0x26   :  { %93 = shalt.err (!%p90_p9)
}
  0x27   :  { %50 = dma.vmem_to_hbm [thread:$0]  %s48_s17, 256, %s134_s2, [#allocation5]  }
  0x28   :  { %104 = dma.done.wait [#allocation5], 256  }
  0x29   :  { %105 = vsyncadd [#allocation5], 4294967040 }
  0x2a   :  { %54 = vsyncpa [#allocation4], 1 }
  0x2b   :  { %55 = vsyncpa [#allocation5], 1 }

</bundles_post_ra>
